<compile_context>
chip_gen: v6e
topology: v6e:2x2x1
jax: 0.10.0
libtpu: 0.0.40
codegen_flags: <defaults>
</compile_context>

<pallas_src>
import jax
import jax.numpy as jnp
from jax.experimental import pallas as pl
from jax.experimental.pallas import tpu as pltpu


# ---------------------------------------------------------------------------
# Kernel
# ---------------------------------------------------------------------------
def _add_bias_kernel(x_ref, b_ref, o_ref):
    # x_ref: (TM, F), b_ref: (1, F) -> broadcast add on the VPU.
    o_ref[...] = x_ref[...] + b_ref[...]


# ---------------------------------------------------------------------------
# Tiling heuristics
# ---------------------------------------------------------------------------
_TM_MAX = 1024                          # rows per tile (amortizes grid-step cost)
_VMEM_BUDGET_BYTES = 16 * 1024 * 1024   # ~4 * TM * F * itemsize (x + out, double-buffered)
_VMEM_LIMIT_BYTES = 32 * 1024 * 1024    # explicit scoped-VMEM limit (safe on all gens)


def _pick_row_tile(M: int, F: int, itemsize: int) -> int:
    """Largest multiple-of-8 row tile that fits the double-buffer VMEM budget."""
    cap = _VMEM_BUDGET_BYTES // (4 * F * itemsize)   # rows allowed by budget
    tm = min(_TM_MAX, (M // 8) * 8, (cap // 8) * 8)
    return max(tm, 8)


def _use_pallas(M: int, F: int) -> bool:
    # Lane-dense outputs only (F multiple of 128) and at least one 8-row sublane
    # block; anything else is faster as a plain fused XLA add.
    return (F % 128 == 0) and (M >= 8)


# ---------------------------------------------------------------------------
# 2-D hot path
# ---------------------------------------------------------------------------
def _add_bias_2d(x2d: jax.Array, bias_row: jax.Array) -> jax.Array:
    """x2d: (M, F), bias_row: (1, F). Row-tiled, pipelined bias add."""
    M, F = x2d.shape
    TM = _pick_row_tile(M, F, x2d.dtype.itemsize)
    grid = (pl.cdiv(M, TM),)            # ragged last block handled by Pallas masking
    return pl.pallas_call(
        _add_bias_kernel,
        out_shape=jax.ShapeDtypeStruct((M, F), x2d.dtype),
        grid_spec=pltpu.PrefetchScalarGridSpec(
            num_scalar_prefetch=0,
            grid=grid,
            in_specs=[
                pl.BlockSpec((TM, F), lambda i: (i, 0)),   # row tile of x
                pl.BlockSpec((1, F), lambda i: (0, 0)),    # bias, resident
            ],
            out_specs=pl.BlockSpec((TM, F), lambda i: (i, 0)),
        ),
        compiler_params=pltpu.CompilerParams(
            dimension_semantics=("parallel",),             # megacore-shardable on v7x
            vmem_limit_bytes=_VMEM_LIMIT_BYTES,
        ),
    )(x2d, bias_row)


# ---------------------------------------------------------------------------
# Module wrapper
# ---------------------------------------------------------------------------
class AddBias:
    """JAX/Pallas port of the PyTorch AddBias module."""

    def __init__(self, bias: jax.Array):
        # Matches nn.Parameter(bias.unsqueeze(1)): stored shape (F, 1)
        self._bias = jnp.asarray(bias).reshape(-1, 1)
        # Precompute the (1, F) row form once; cache per-dtype casts.
        row = self._bias.reshape(1, -1)
        self._row_cache = {row.dtype: row}

    def _bias_row(self, dtype) -> jax.Array:
        row = self._row_cache.get(dtype)
        if row is None:
            row = next(iter(self._row_cache.values())).astype(dtype)
            self._row_cache[dtype] = row
        return row

    def __call__(self, x: jax.Array) -> jax.Array:
        F = x.shape[-1]
        row = self._bias_row(x.dtype)           # (1, F)

        if x.ndim == 2:
            x2d, lead = x, None                 # bias = self._bias.t().view(1, -1)
        else:
            # bias = self._bias.t().squeeze(0) -> (F,), broadcast over last axis.
            lead = x.shape[:-1]
            x2d = x.reshape(-1, F)

        M = x2d.shape[0]
        if _use_pallas(M, F):
            out2d = _add_bias_2d(x2d, row)
        else:
            # Tiny / lane-sparse shapes: plain XLA add beats pallas_call overhead.
            out2d = x2d + row

        return out2d if lead is None else out2d.reshape(*lead, F)


# ---------------------------------------------------------------------------
# Demo / self-test
# ---------------------------------------------------------------------------
if __name__ == "__main__":
    key = jax.random.PRNGKey(0)
    k1, k2, k3, k4, k5 = jax.random.split(key, 5)

    hidden = 128  # lane-dense -> exercises the Pallas path
    bias_param = jax.random.normal(k1, (hidden,), dtype=jnp.float32)
    module = AddBias(bias_param)

    # ---- 2D case, even rows (Pallas path) ----
    x2 = jax.random.normal(k2, (16, hidden), dtype=jnp.float32)
    out2 = jax.block_until_ready(module(x2))
    ref2 = x2 + bias_param.reshape(1, -1)
    assert jnp.allclose(out2, ref2, atol=1e-6), "2D AddBias mismatch"

    # ---- 2D case, ragged row count (Pallas path with masked tail block) ----
    x2b = jax.random.normal(k3, (20, hidden), dtype=jnp.float32)
    out2b = jax.block_until_ready(module(x2b))
    ref2b = x2b + bias_param.reshape(1, -1)
    assert jnp.allclose(out2b, ref2b, atol=1e-6), "ragged 2D AddBias mismatch"

    # ---- >2D case (B, C, S, F): bias broadcast over last axis (Pallas path) ----
    x4 = jax.random.normal(k4, (2, 4, 8, hidden), dtype=jnp.float32)
    out4 = jax.block_until_ready(module(x4))
    ref4 = x4 + bias_param.reshape(1, 1, 1, -1)
    assert jnp.allclose(out4, ref4, atol=1e-6), "4D AddBias mismatch"

    # ---- tiny / lane-sparse case (hidden=32, batch=2): XLA fallback path ----
    small_bias = jax.random.normal(k5, (32,), dtype=jnp.float32)
    small_mod = AddBias(small_bias)
    xs = jax.random.normal(k2, (2, 32), dtype=jnp.float32)
    outs = jax.block_until_ready(small_mod(xs))
    assert jnp.allclose(outs, xs + small_bias.reshape(1, -1), atol=1e-6), \
        "small AddBias mismatch"

    print("KERNEL_OK")
</pallas_src>

<mosaic_0001>
module attributes {stable_mosaic.version = 11 : i64} {
  func.func @_add_bias_kernel(%arg0: i32, %arg1: memref<16x128xf32, #tpu.memory_space<vmem>>, %arg2: memref<1x128xf32, #tpu.memory_space<vmem>>, %arg3: memref<16x128xf32, #tpu.memory_space<vmem>>) attributes {dimension_semantics = [#tpu.dimension_semantics<parallel>], iteration_bounds = array<i64: 1>, scalar_prefetch = 0 : i64, scratch_operands = 0 : i64, tpu.core_type = #tpu.core_type<tc>, window_params = [{transform_indices = @transform_0, window_bounds = array<i64: 16, 128>}, {pipeline_mode = #tpu.pipeline_mode<synchronous>, transform_indices = @transform_1, window_bounds = array<i64: 1, 128>}, {transform_indices = @transform_2, window_bounds = array<i64: 16, 128>}]} {
    %c0 = arith.constant 0 : index
    %c0_0 = arith.constant 0 : index
    %0 = vector.load %arg1[%c0, %c0_0] : memref<16x128xf32, #tpu.memory_space<vmem>>, vector<16x128xf32>
    %c0_1 = arith.constant 0 : index
    %c0_2 = arith.constant 0 : index
    %1 = vector.load %arg2[%c0_1, %c0_2] : memref<1x128xf32, #tpu.memory_space<vmem>>, vector<1x128xf32>
    %2 = vector.broadcast %1 : vector<1x128xf32> to vector<16x128xf32>
    %3 = arith.addf %0, %2 : vector<16x128xf32>
    %c0_3 = arith.constant 0 : index
    %c0_4 = arith.constant 0 : index
    %4 = vector.load %arg3[%c0_3, %c0_4] : memref<16x128xf32, #tpu.memory_space<vmem>>, vector<16x128xf32>
    tpu.vector_store %arg3[%c0_3, %c0_4], %3 {strides = array<i32>} : memref<16x128xf32, #tpu.memory_space<vmem>>, vector<16x128xf32>,
    return
  }
  func.func @transform_0(%arg0: i32) -> (i32, i32) {
    %c0_i32 = arith.constant 0 : i32
    %c0_i32_0 = arith.constant 0 : i32
    return %arg0, %c0_i32 : i32, i32
  }
  func.func @transform_1(%arg0: i32) -> (i32, i32) {
    %c0_i32 = arith.constant 0 : i32
    %c0_i32_0 = arith.constant 0 : i32
    %c0_i32_1 = arith.constant 0 : i32
    return %c0_i32, %c0_i32_0 : i32, i32
  }
  func.func @transform_2(%arg0: i32) -> (i32, i32) {
    %c0_i32 = arith.constant 0 : i32
    %c0_i32_0 = arith.constant 0 : i32
    return %arg0, %c0_i32 : i32, i32
  }
}

</mosaic_0001>

<bundles_post_ra>
// kernel: tpu_custom_call.1
= control target key start
LH: loop header
LB: loop body
LE: loop exit
PB: predicated region body
PF: predicated region fallthrough
CT: control target
= control target key end

     0   :  { %7 = vsyncpa [#allocation3], 0  ;;  %s133_s0 = inlined_call_operand.hbm [shape: f32[16,128], index: 0, kind: input, shape index: {}]   ;;  %s134_s1 = inlined_call_operand.vmem [shape: f32[1,128], index: 1, kind: input, shape index: {}]   ;;  %s135_s2 = inlined_call_operand.hbm [shape: f32[16,128], index: 2, kind: output, shape index: {}]  }
   0x1   :  { %8 = vsyncpa [#allocation4], 0  ;;  %s105_s9 = smov [#allocation2]  }
   0x2   :  { %s14_s10 = sshll.u32 %s105_s9, 4  ;;  %s15_s10 = int_to_ptr.vmem [resolvable:$true] %s14_s10 }
   0x3   :  { %s69_s11 = scalar_lea.vmem %s15_s10, 256  ;;  %p74_p1 = scmp.lt.s32.totalorder %s15_s10, %s15_s10 }
   0x4   :  { %p70_p0 = scmp.ne.s32.totalorder %s15_s10, %s69_s11  ;;  %p75_p2 = scmp.lt.s32.totalorder %s69_s11, %s69_s11 }
   0x6   :  { %p76_p3 = por %p75_p2, %p74_p1 }
   0x8   :  { %p77_p4 = pnand %p76_p3, %p70_p0 }
   0xa   :  { %80 = shalt.err (!%p77_p4)
}
   0xb   :  { %s106_s12 = smov 128   ;;  %s107_s13 = smov 8  }
   0xc   :  { %20 = dma.hbm_to_vmem [thread:$0]  %s133_s0, 256, %s15_s10, [#allocation3], %s106_s12, %s106_s12, %s107_s13  }
   0xd   :  { %101 = dma.done.wait [#allocation3], 256  }
   0xe   :  { %102 = vsyncadd [#allocation3], 4294967040  ;;  %s108_s16 = smov [#allocation5]   ;;  %v26_v0 = vld [vmem:[#allocation2] sm:$0xff]  ;;  %v27_v2 = vld [vmem:[#allocation2 + $0x8] sm:$0xff] }
   0xf   :  { %s44_s17 = sshll.u32 %s108_s16, 4  ;;  %v56_v1 = vld [vmem:[%s134_s1] ss:$0 sm:$0xff]  ;;  %s45_s17 = int_to_ptr.vmem [resolvable:$true] %s44_s17 }
  0x10   :  { %v35_v3 = vadd.f32 %v56_v1, %v26_v0  ;;  %v36_v4 = vadd.f32 %v56_v1, %v27_v2  ;;  %s81_s20 = scalar_lea.vmem %s45_s17, 256  ;;  %p86_p6 = scmp.lt.s32.totalorder %s45_s17, %s45_s17 }
  0x11   :  { %p82_p5 = scmp.ne.s32.totalorder %s45_s17, %s81_s20  ;;  %p87_p7 = scmp.lt.s32.totalorder %s81_s20, %s81_s20 }
  0x12   :  { %37 = vst [vmem:[#allocation5] sm:$0xff] %v35_v3  ;;  %38 = vst [vmem:[#allocation5 + $0x8] sm:$0xff] %v36_v4 }
  0x13   :  { %p88_p8 = por %p87_p7, %p86_p6 }
  0x15   :  { %p89_p9 = pnand %p88_p8, %p82_p5 }
  0x17   :  { %92 = shalt.err (!%p89_p9)
}
  0x18   :  { %50 = dma.vmem_to_hbm [thread:$0]  %s45_s17, 256, %s135_s2, [#allocation4], %s106_s12, %s106_s12, %s107_s13  }
  0x19   :  { %103 = dma.done.wait [#allocation4], 256  }
  0x1a   :  { %104 = vsyncadd [#allocation4], 4294967040 }
  0x1b   :  { %54 = vsyncpa [#allocation3], 1 }
  0x1c   :  { %55 = vsyncpa [#allocation4], 1 }

</bundles_post_ra>
